<compile_context>
chip_gen: v7x
topology: tpu7x:2x2x1
jax: 0.10.0
libtpu: 0.0.40
codegen_flags: <defaults>
</compile_context>

<pallas_src>
import functools

import jax
import jax.numpy as jnp
from jax.experimental import pallas as pl
from jax.experimental.pallas import tpu as pltpu

_INV_SQRT2 = 0.7071067811865476  # 1/sqrt(2)


def _round_up(x, m):
    return ((x + m - 1) // m) * m


@functools.lru_cache(maxsize=1)
def _tpu_vmem_capacity():
    """Physical VMEM per core (bytes); conservative fallback if query fails."""
    try:
        cap = getattr(pltpu.get_tpu_info(), "vmem_capacity_bytes", None)
        if cap:
            return int(cap)
    except Exception:
        pass
    return 64 << 20  # v7x-sized fallback is safe on every generation


def _mlp_kernel(x_ref, w1_ref, b1_ref, w2_ref, b2_ref, o_ref, acc_ref):
    k = pl.program_id(1)

    @pl.when(k == 0)
    def _():
        acc_ref[...] = jnp.zeros_like(acc_ref)

    # fc1 chunk: (tm, Cp) @ (Cp, tH) on the MXU, f32 accumulation, f32 bias.
    x = x_ref[...].astype(w1_ref.dtype)            # cast in-kernel, per tile
    h = jnp.dot(x, w1_ref[...], preferred_element_type=jnp.float32)
    h = h + b1_ref[...]
    # Exact (erf-based) GELU, matching torch.nn.GELU default numerics.
    h = 0.5 * h * (1.0 + jax.lax.erf(h * _INV_SQRT2))
    # Dropout(p=0.0) is the identity.
    # fc2 partial: (tm, tH) @ (tH, Cop), accumulated into the f32 scratch.
    acc_ref[...] += jnp.dot(h.astype(w2_ref.dtype), w2_ref[...],
                            preferred_element_type=jnp.float32)

    @pl.when(k == pl.num_programs(1) - 1)
    def _():
        o_ref[...] = (acc_ref[...] + b2_ref[...]).astype(o_ref.dtype)


@functools.partial(
    jax.jit,
    static_argnames=("tile_m", "tile_h", "compute_dtype", "out_dtype"))
def mlp_pallas(x, w1, b1, w2, b2, *, tile_m=None, tile_h=512,
               compute_dtype=jnp.bfloat16, out_dtype=None):
    """ViT-style MLP: fc2(GELU(fc1(x))), dropout p=0 -> identity.

    x:  (B, N, C);  w1: (C, H) = fc1.weight.T;  b1: (H,)
    w2: (H, Co) = fc2.weight.T;  b2: (Co,).  Returns (B, N, Co).
    Pass compute_dtype=jnp.float32 for tighter (non-bf16) numerics.
    """
    B, N, C = x.shape
    H = w1.shape[1]
    Co = w2.shape[1]
    M = B * N
    out_dtype = jnp.dtype(out_dtype) if out_dtype is not None else x.dtype
    cd = jnp.dtype(compute_dtype)

    vmem_cap = _tpu_vmem_capacity()

    # ---- tile choices -------------------------------------------------------
    # Generation-aware tile_m: 512 on 128-MiB-VMEM parts (v5e/v6e), 256 on v7x.
    if tile_m is None:
        tile_m = 512 if vmem_cap >= (96 << 20) else 256
    tm = max(8, _round_up(min(tile_m, _round_up(M, 8)), 8))
    # v7x has 2 TensorCores sharing the "parallel" axis: ensure >= 2 M tiles
    # whenever M allows it (costs only ~0.35us/extra step on v5e/v6e).
    if M > 8 and (M + tm - 1) // tm < 2:
        tm = _round_up((M + 1) // 2, 8)

    # Lane-dense last dims.  Hidden dim aligned to 256 when big enough so odd
    # multiples of 128 don't waste half an MXU pass on v6e/v7x (256x256 MXU).
    Cp = _round_up(C, 128)
    Cop = _round_up(Co, 128)
    h_align = 256 if H >= 256 else 128
    tH = max(h_align,
             _round_up(min(tile_h, _round_up(H, h_align)), h_align))

    x_b = jnp.dtype(x.dtype).itemsize
    out_b = jnp.dtype(out_dtype).itemsize
    cd_b = cd.itemsize

    def _budget(tm_, th_):
        return (2 * tm_ * Cp * x_b            # x tile (double-buffered)
                + 2 * tm_ * Cop * out_b       # out tile (double-buffered)
                + 2 * Cp * th_ * cd_b         # streamed w1 slice
                + 2 * th_ * Cop * cd_b        # streamed w2 slice
                + 2 * 8 * (th_ + Cop) * 4     # biases (sublane-padded)
                + tm_ * Cop * 4               # f32 accumulator scratch
                + tm_ * th_ * (4 + cd_b)      # f32 h + its compute-dtype copy
                + tm_ * Cp * cd_b)            # in-kernel x cast temp

    budget_cap = max(int(vmem_cap * 0.85), 16 << 20)
    while _budget(tm, tH) > budget_cap and tH > h_align:
        tH = max(h_align, _round_up(tH // 2, h_align))
    while _budget(tm, tH) > budget_cap and tm > 8:
        tm = max(8, _round_up(tm // 2, 8))

    Mp = _round_up(M, tm)
    Hp = _round_up(H, tH)
    grid = (Mp // tm, Hp // tH)

    # ---- wrapper-side layout: pad only when actually needed ----------------
    x2d = x.reshape(M, C)
    if (Mp, Cp) != (M, C):
        x2d = jnp.pad(x2d, ((0, Mp - M), (0, Cp - C)))
    w1p = w1.astype(cd)
    if (Cp, Hp) != (C, H):
        w1p = jnp.pad(w1p, ((0, Cp - C), (0, Hp - H)))
    w2p = w2.astype(cd)
    if (Hp, Cop) != (H, Co):
        w2p = jnp.pad(w2p, ((0, Hp - H), (0, Cop - Co)))
    b1p = jnp.pad(b1.astype(jnp.float32), (0, Hp - H)).reshape(1, Hp)
    b2p = jnp.pad(b2.astype(jnp.float32), (0, Cop - Co)).reshape(1, Cop)

    vmem_limit = min(max(int(_budget(tm, tH) * 1.25) + (4 << 20), 32 << 20),
                     budget_cap)

    n_mt = Mp // tm
    cost = pl.CostEstimate(
        flops=2 * Mp * Cp * Hp + 2 * Mp * Hp * Cop,
        transcendentals=Mp * Hp,
        bytes_accessed=(x2d.size * x_b
                        + n_mt * (w1p.size + w2p.size) * cd_b
                        + (b1p.size + b2p.size) * 4
                        + Mp * Cop * out_b),
    )

    out2d = pl.pallas_call(
        _mlp_kernel,
        out_shape=jax.ShapeDtypeStruct((Mp, Cop), out_dtype),
        grid_spec=pltpu.PrefetchScalarGridSpec(
            num_scalar_prefetch=0,
            grid=grid,
            in_specs=[
                pl.BlockSpec((tm, Cp), lambda i, k: (i, 0)),    # x tile (reused over k)
                pl.BlockSpec((Cp, tH), lambda i, k: (0, k)),    # streamed w1 slice
                pl.BlockSpec((1, tH), lambda i, k: (0, k)),     # b1 slice
                pl.BlockSpec((tH, Cop), lambda i, k: (k, 0)),   # streamed w2 slice
                pl.BlockSpec((1, Cop), lambda i, k: (0, 0)),    # b2 (resident)
            ],
            out_specs=pl.BlockSpec((tm, Cop), lambda i, k: (i, 0)),
            scratch_shapes=[pltpu.VMEM((tm, Cop), jnp.float32)],
        ),
        compiler_params=pltpu.CompilerParams(
            dimension_semantics=("parallel", "arbitrary"),
            vmem_limit_bytes=vmem_limit,
        ),
        cost_estimate=cost,
    )(x2d, w1p, b1p, w2p, b2p)

    if (Mp, Cop) != (M, Co):
        out2d = out2d[:M, :Co]
    return out2d.reshape(B, N, Co)


def _reference_mlp(x, w1, b1, w2, b2):
    h = x @ w1 + b1
    h = 0.5 * h * (1.0 + jax.lax.erf(h * _INV_SQRT2))
    return h @ w2 + b2


if __name__ == "__main__":
    key = jax.random.PRNGKey(0)
    B, N = 2, 8                       # batch, sequence length
    C_in, Hid, C_out = 32, 64, 32     # in_features, hidden_features, out_features

    k_x, k_w1, k_b1, k_w2, k_b2 = jax.random.split(key, 5)
    x = jax.random.normal(k_x, (B, N, C_in), dtype=jnp.float32)
    # Parameters initialized deterministically (synthetic, not a checkpoint).
    # Stored transposed vs. PyTorch nn.Linear: w1 = fc1.weight.T, w2 = fc2.weight.T
    w1 = jax.random.normal(k_w1, (C_in, Hid), dtype=jnp.float32) * 0.05
    b1 = jax.random.normal(k_b1, (Hid,), dtype=jnp.float32) * 0.01
    w2 = jax.random.normal(k_w2, (Hid, C_out), dtype=jnp.float32) * 0.05
    b2 = jax.random.normal(k_b2, (C_out,), dtype=jnp.float32) * 0.01

    y = mlp_pallas(x, w1, b1, w2, b2)
    jax.block_until_ready(y)

    y_ref = _reference_mlp(x, w1, b1, w2, b2)
    assert y.shape == (B, N, C_out)
    # bf16 MXU inputs with f32 accumulation -> compare against f32 reference
    # with a tolerance appropriate for bf16 rounding of x/w/h.
    assert jnp.allclose(y, y_ref, atol=3e-2, rtol=3e-2), "mismatch vs reference"

    print("KERNEL_OK")
</pallas_src>

<mosaic_0001>
module attributes {stable_mosaic.version = 11 : i64} {
  func.func @_mlp_kernel(%arg0: i32, %arg1: i32, %arg2: memref<8x128xf32, #tpu.memory_space<vmem>>, %arg3: memref<128x128xbf16, #tpu.memory_space<vmem>>, %arg4: memref<1x128xf32, #tpu.memory_space<vmem>>, %arg5: memref<128x128xbf16, #tpu.memory_space<vmem>>, %arg6: memref<1x128xf32, #tpu.memory_space<vmem>>, %arg7: memref<8x128xf32, #tpu.memory_space<vmem>>, %arg8: memref<8x128xf32, #tpu.memory_space<vmem>>) attributes {dimension_semantics = [#tpu.dimension_semantics<parallel>, #tpu.dimension_semantics<arbitrary>], iteration_bounds = array<i64: 2, 1>, scalar_prefetch = 0 : i64, scratch_operands = 1 : i64, tpu.core_type = #tpu.core_type<tc>, window_params = [{transform_indices = @transform_0, window_bounds = array<i64: 8, 128>}, {transform_indices = @transform_1, window_bounds = array<i64: 128, 128>}, {transform_indices = @transform_2, window_bounds = array<i64: 1, 128>}, {transform_indices = @transform_3, window_bounds = array<i64: 128, 128>}, {pipeline_mode = #tpu.pipeline_mode<synchronous>, transform_indices = @transform_4, window_bounds = array<i64: 1, 128>}, {transform_indices = @transform_5, window_bounds = array<i64: 8, 128>}]} {
    %c0_i32 = arith.constant 0 : i32
    %0 = arith.cmpi eq, %arg1, %c0_i32 : i32
    %1 = arith.extui %0 : i1 to i32
    %c0_i32_0 = arith.constant 0 : i32
    %2 = arith.cmpi ne, %1, %c0_i32_0 : i32
    scf.if %2 {
      %cst_18 = arith.constant 0.000000e+00 : f32
      %27 = vector.broadcast %cst_18 : f32 to vector<8x128xf32>
      %c0_19 = arith.constant 0 : index
      %c0_20 = arith.constant 0 : index
      %28 = vector.load %arg8[%c0_19, %c0_20] : memref<8x128xf32, #tpu.memory_space<vmem>>, vector<8x128xf32>
      tpu.vector_store %arg8[%c0_19, %c0_20], %27 {strides = array<i32>} : memref<8x128xf32, #tpu.memory_space<vmem>>, vector<8x128xf32>,
    } else {
    }
    %c0 = arith.constant 0 : index
    %c0_1 = arith.constant 0 : index
    %3 = vector.load %arg2[%c0, %c0_1] : memref<8x128xf32, #tpu.memory_space<vmem>>, vector<8x128xf32>
    %4 = arith.truncf %3 : vector<8x128xf32> to vector<8x128xbf16>
    %c0_2 = arith.constant 0 : index
    %c0_3 = arith.constant 0 : index
    %5 = vector.load %arg3[%c0_2, %c0_3] : memref<128x128xbf16, #tpu.memory_space<vmem>>, vector<128x128xbf16>
    %cst = arith.constant dense<0.000000e+00> : vector<8x128xf32>
    %6 = tpu.matmul %4, %5, %cst {dimension_numbers = #tpu.dot_dimension_numbers<[1], [0], [0], [1], [0, 0, 1, 1], [], []>} : vector<8x128xbf16>, vector<128x128xbf16>, vector<8x128xf32> -> vector<8x128xf32>
    %c0_4 = arith.constant 0 : index
    %c0_5 = arith.constant 0 : index
    %7 = vector.load %arg4[%c0_4, %c0_5] : memref<1x128xf32, #tpu.memory_space<vmem>>, vector<1x128xf32>
    %8 = vector.broadcast %7 : vector<1x128xf32> to vector<8x128xf32>
    %9 = arith.addf %6, %8 : vector<8x128xf32>
    %cst_6 = arith.constant 5.000000e-01 : f32
    %10 = vector.broadcast %cst_6 : f32 to vector<8x128xf32>
    %11 = arith.mulf %10, %9 : vector<8x128xf32>
    %cst_7 = arith.constant 0.707106769 : f32
    %12 = vector.broadcast %cst_7 : f32 to vector<8x128xf32>
    %13 = arith.mulf %9, %12 : vector<8x128xf32>
    %14 = math.erf %13 : vector<8x128xf32>
    %cst_8 = arith.constant 1.000000e+00 : f32
    %15 = vector.broadcast %cst_8 : f32 to vector<8x128xf32>
    %16 = arith.addf %15, %14 : vector<8x128xf32>
    %17 = arith.mulf %11, %16 : vector<8x128xf32>
    %c0_9 = arith.constant 0 : index
    %c0_10 = arith.constant 0 : index
    %18 = vector.load %arg8[%c0_9, %c0_10] : memref<8x128xf32, #tpu.memory_space<vmem>>, vector<8x128xf32>
    %19 = arith.truncf %17 : vector<8x128xf32> to vector<8x128xbf16>
    %c0_11 = arith.constant 0 : index
    %c0_12 = arith.constant 0 : index
    %20 = vector.load %arg5[%c0_11, %c0_12] : memref<128x128xbf16, #tpu.memory_space<vmem>>, vector<128x128xbf16>
    %cst_13 = arith.constant dense<0.000000e+00> : vector<8x128xf32>
    %21 = tpu.matmul %19, %20, %cst_13 {dimension_numbers = #tpu.dot_dimension_numbers<[1], [0], [0], [1], [0, 0, 1, 1], [], []>} : vector<8x128xbf16>, vector<128x128xbf16>, vector<8x128xf32> -> vector<8x128xf32>
    %22 = arith.addf %18, %21 : vector<8x128xf32>
    %c0_14 = arith.constant 0 : index
    %c0_15 = arith.constant 0 : index
    %23 = vector.load %arg8[%c0_14, %c0_15] : memref<8x128xf32, #tpu.memory_space<vmem>>, vector<8x128xf32>
    tpu.vector_store %arg8[%c0_14, %c0_15], %22 {strides = array<i32>} : memref<8x128xf32, #tpu.memory_space<vmem>>, vector<8x128xf32>,
    %c0_i32_16 = arith.constant 0 : i32
    %24 = arith.cmpi eq, %arg1, %c0_i32_16 : i32
    %25 = arith.extui %24 : i1 to i32
    %c0_i32_17 = arith.constant 0 : i32
    %26 = arith.cmpi ne, %25, %c0_i32_17 : i32
    scf.if %26 {
      %c0_18 = arith.constant 0 : index
      %c0_19 = arith.constant 0 : index
      %27 = vector.load %arg8[%c0_18, %c0_19] : memref<8x128xf32, #tpu.memory_space<vmem>>, vector<8x128xf32>
      %c0_20 = arith.constant 0 : index
      %c0_21 = arith.constant 0 : index
      %28 = vector.load %arg6[%c0_20, %c0_21] : memref<1x128xf32, #tpu.memory_space<vmem>>, vector<1x128xf32>
      %29 = vector.broadcast %28 : vector<1x128xf32> to vector<8x128xf32>
      %30 = arith.addf %27, %29 : vector<8x128xf32>
      %c0_22 = arith.constant 0 : index
      %c0_23 = arith.constant 0 : index
      %31 = vector.load %arg7[%c0_22, %c0_23] : memref<8x128xf32, #tpu.memory_space<vmem>>, vector<8x128xf32>
      tpu.vector_store %arg7[%c0_22, %c0_23], %30 {strides = array<i32>} : memref<8x128xf32, #tpu.memory_space<vmem>>, vector<8x128xf32>,
    } else {
    }
    return
  }
  func.func @transform_0(%arg0: i32, %arg1: i32) -> (i32, i32) {
    %c0_i32 = arith.constant 0 : i32
    %c0_i32_0 = arith.constant 0 : i32
    return %arg0, %c0_i32 : i32, i32
  }
  func.func @transform_1(%arg0: i32, %arg1: i32) -> (i32, i32) {
    %c0_i32 = arith.constant 0 : i32
    %c0_i32_0 = arith.constant 0 : i32
    return %c0_i32, %arg1 : i32, i32
  }
  func.func @transform_2(%arg0: i32, %arg1: i32) -> (i32, i32) {
    %c0_i32 = arith.constant 0 : i32
    %c0_i32_0 = arith.constant 0 : i32
    return %c0_i32, %arg1 : i32, i32
  }
  func.func @transform_3(%arg0: i32, %arg1: i32) -> (i32, i32) {
    %c0_i32 = arith.constant 0 : i32
    %c0_i32_0 = arith.constant 0 : i32
    return %arg1, %c0_i32 : i32, i32
  }
  func.func @transform_4(%arg0: i32, %arg1: i32) -> (i32, i32) {
    %c0_i32 = arith.constant 0 : i32
    %c0_i32_0 = arith.constant 0 : i32
    %c0_i32_1 = arith.constant 0 : i32
    return %c0_i32, %c0_i32_0 : i32, i32
  }
  func.func @transform_5(%arg0: i32, %arg1: i32) -> (i32, i32) {
    %c0_i32 = arith.constant 0 : i32
    %c0_i32_0 = arith.constant 0 : i32
    return %arg0, %c0_i32 : i32, i32
  }
}

</mosaic_0001>

<bundles_post_ra>
// kernel: mlp_pallas.1
= control target key start
LH: loop header
LB: loop body
LE: loop exit
PB: predicated region body
PF: predicated region fallthrough
CT: control target
= control target key end

     0   :  { %s822_s18 = smov 0   ;;  %s824_s19 = smov 0   ;;  %s920_s0 = inlined_call_operand.vmem [shape: f32[16,128], index: 0, kind: input, shape index: {}]   ;;  %s921_s1 = inlined_call_operand.vmem [shape: bf16[128,128], index: 1, kind: input, shape index: {}]   ;;  %s922_s2 = inlined_call_operand.vmem [shape: f32[1,128], index: 2, kind: input, shape index: {}]   ;;  %s923_s3 = inlined_call_operand.vmem [shape: bf16[128,128], index: 3, kind: input, shape index: {}]   ;;  %s924_s4 = inlined_call_operand.vmem [shape: f32[1,128], index: 4, kind: input, shape index: {}]   ;;  %s925_s5 = inlined_call_operand.vmem [shape: f32[16,128], index: 5, kind: output, shape index: {}]  }
   0x1   :  { %s826_s20 = smov 0  }
   0x2 LB: > { %s27_s21 = sadd.s32 1, %s784_s19  ;;  %p641_p0 = scmp.ge.s32.totalorder %s788_s20, 1  ;;  %s788_s20 = sphi %s826_s20, %s15_s20   ;;  %s784_s19 = sphi %s824_s19, %s927_s19   ;;  %s780_s18 = sphi %s822_s18, %s926_s18  }
   0x3   : > { %p29_p1 = scmp.ge.s32.totalorder %s27_s21, 2  ;;  %p226_p2 = scmp.lt.s32.totalorder %s788_s20, 3 }
   0x5   : > { %s929_s21 = smov (%p29_p1, %s27_s21), 0  ;;  %p227_p3 = pnand %p641_p0, %p226_p2 }
   0x6   : > { %v748_v0 = vld [vmem:[%s921_s1] sm:$0xff] (!%p227_p3)   ;;  %v790_v1 = vmov (!%p227_p3), 0.0   ;;  %v749_v2 = vld [vmem:[%s921_s1 + $0x8] sm:$0xff] (!%p227_p3)   ;;  %vm791_vm0 = vmmov (!%p227_p3), 0   ;;  %v750_v3 = vld [vmem:[%s921_s1 + $0x10] sm:$0xff] (!%p227_p3)   ;;  %p264_p4 = scmp.lt.s32.totalorder (!%p227_p3), %s780_s18, 1 }
   0x7   : > { %230 = sbr.rel (%p227_p3) target bundleno = 487 (0x1e7), region = 40  ;;  %682 = vmatprep.subr.bf16.mxu0 (!%p227_p3), %v790_v1  ;;  %702 = vmatprep.subr.bf16.mxu1 (!%p227_p3), %v790_v1  ;;  %v756_v4 = vld [vmem:[%s923_s3] sm:$0xff] (!%p227_p3)   ;;  %v751_v5 = vld [vmem:[%s921_s1 + $0x18] sm:$0xff] (!%p227_p3)   ;;  %v757_v6 = vld [vmem:[%s923_s3 + $0x8] sm:$0xff] (!%p227_p3)  }
   0x8   : > { %683 = vmatpush3.bf16.msra.mxu0 (!%p227_p3), %v748_v0  ;;  %698 = vmatprep.mubr.msk.bf16.mxu0 (!%p227_p3), %vm791_vm0, %v790_v1  ;;  %v752_v7 = vld [vmem:[%s921_s1 + $0x20] sm:$0xff] (!%p227_p3)   ;;  %v758_v8 = vld [vmem:[%s923_s3 + $0x10] sm:$0xff] (!%p227_p3)   ;;  %v753_v9 = vld [vmem:[%s921_s1 + $0x28] sm:$0xff] (!%p227_p3)  }
   0x9   : > { %684 = vmatprep.subr.bf16.mxu0 (!%p227_p3), %v790_v1  ;;  %718 = vmatprep.mubr.msk.bf16.mxu1 (!%p227_p3), %vm791_vm0, %v790_v1  ;;  %v754_v10 = vld [vmem:[%s921_s1 + $0x30] sm:$0xff] (!%p227_p3)   ;;  %v755_v11 = vld [vmem:[%s921_s1 + $0x38] sm:$0xff] (!%p227_p3)   ;;  %v760_v15 = vld [vmem:[%s923_s3 + $0x20] sm:$0xff] (!%p227_p3)  }
   0xa   : > { %703 = vmatpush3.bf16.msra.mxu1 (!%p227_p3), %v756_v4  ;;  %v759_v14 = vld [vmem:[%s923_s3 + $0x18] sm:$0xff] (!%p227_p3)   ;;  %v761_v16 = vld [vmem:[%s923_s3 + $0x28] sm:$0xff] (!%p227_p3)   ;;  %v762_v17 = vld [vmem:[%s923_s3 + $0x30] sm:$0xff] (!%p227_p3)  }
   0xb   : > { %704 = vmatprep.subr.bf16.mxu1 (!%p227_p3), %v790_v1  ;;  %v763_v18 = vld [vmem:[%s923_s3 + $0x38] sm:$0xff] (!%p227_p3)   ;;  %v644_v19 = vld [vmem:[%s922_s2] ss:$0 sm:$0xff] (!%p227_p3) }
   0xc   : > { %685 = vmatpush3.bf16.msra.mxu0 (!%p227_p3), %v749_v2  ;;  %v661_v31 = vld [vmem:[%s924_s4] ss:$0 sm:$0xff] (!%p227_p3) }
   0xd   : > { %686 = vmatprep.subr.bf16.mxu0 (!%p227_p3), %v790_v1 }
   0xe   : > { %705 = vmatpush3.bf16.msra.mxu1 %v757_v6  ;;  %s931_s18 = smov (!%p264_p4, %s780_s18), 1 }
   0xf   : > { %706 = vmatprep.subr.bf16.mxu1 %v790_v1  ;;  %s642_s15 = sshll.u32 %s931_s18, 3 }
  0x10   : > { %687 = vmatpush3.bf16.msra.mxu0 %v750_v3  ;;  %s267_s24 = scalar_lea.vmem %s920_s0, %s642_s15  ;;  %s284_s23 = scalar_lea.vmem %s925_s5, %s642_s15 }
  0x11   : > { %688 = vmatprep.subr.bf16.mxu0 %v790_v1  ;;  %v291_v12 = vld [vmem:[%s267_s24] sm:$0xff] }
  0x12   : > { %707 = vmatpush3.bf16.msra.mxu1 %v758_v8  ;;  %v292_v13 = vpack.c.bf16 %v291_v12, %v291_v12 }
  0x13   : > { %708 = vmatprep.subr.bf16.mxu1 %v790_v1 }
  0x14   : > { %689 = vmatpush3.bf16.msra.mxu0 %v751_v5 }
  0x15   : > { %690 = vmatprep.subr.bf16.mxu0 %v790_v1 }
  0x16   : > { %709 = vmatpush3.bf16.msra.mxu1 %v759_v14 }
  0x17   : > { %710 = vmatprep.subr.bf16.mxu1 %v790_v1 }
  0x18   : > { %691 = vmatpush3.bf16.msra.mxu0 %v752_v7 }
  0x19   : > { %692 = vmatprep.subr.bf16.mxu0 %v790_v1 }
  0x1a   : > { %711 = vmatpush3.bf16.msra.mxu1 %v760_v15 }
  0x1b   : > { %712 = vmatprep.subr.bf16.mxu1 %v790_v1 }
  0x1c   : > { %693 = vmatpush3.bf16.msra.mxu0 %v753_v9 }
  0x1d   : > { %694 = vmatprep.subr.bf16.mxu0 %v790_v1 }
  0x1e   : > { %713 = vmatpush3.bf16.msra.mxu1 %v761_v16 }
  0x1f   : > { %714 = vmatprep.subr.bf16.mxu1 %v790_v1 }
  0x20   : > { %695 = vmatpush3.bf16.msra.mxu0 %v754_v10 }
  0x21   : > { %696 = vmatprep.subr.bf16.mxu0 %v790_v1 }
  0x22   : > { %715 = vmatpush3.bf16.msra.mxu1 %v762_v17 }
  0x23   : > { %716 = vmatprep.subr.bf16.mxu1 %v790_v1 }
  0x24   : > { %697 = vmatpush3.bf16.msra.mxu0 %v755_v11 }
  0x26   : > { %717 = vmatpush3.bf16.msra.mxu1 %v763_v18 }
  0x27   : > { %699 = vmatmul.mubr.bf16.vlgmr.msra.gmra.mrb[0].mxu0 %v292_v13 }
  0xfa   : > { %v398_v20 = vpop.f32.mrb[0].mxu0 }
  0xfb   : > { %v399_v21 = vadd.f32 %v644_v19, %v398_v20  ;;  %v700_v22 = vpop.f32.mrb[1].mxu0 }
  0xfc   : > { %v401_v23 = vpop.f32.mrb[2].mxu0 }
  0xfd   : > { %v405_v24 = vmul.f32 0.70710677, %v399_v21  ;;  %v701_v25 = vpop.f32.mrb[3].mxu0  ;;  %v404_v27 = vmul.f32 0.5, %v399_v21 }
  0xff   : > { %764 = verf.f32 %v405_v24 }
 0x109   : > { %v765_v26 = vpop.eup %764 }
 0x10a   : > { %v407_v28 = vadd.f32 1.0, %v765_v26 }
 0x10c   : > { %v408_v29 = vmul.f32 %v407_v28, %v404_v27 }
 0x10e   : > { %v410_v30 = vpack.c.bf16 %v408_v29, %v408_v29 }
 0x110   : > { %719 = vmatmul.mubr.bf16.vlgmr.msra.gmra.mrb[0].mxu1 %v410_v30 }
 0x1e3   : > { %v509_v32 = vpop.f32.mrb[0].mxu1 }
 0x1e4   : > { %v528_v33 = vadd.f32 %v661_v31, %v509_v32  ;;  %v720_v34 = vpop.f32.mrb[1].mxu1 }
 0x1e5   : > { %v512_v35 = vpop.f32.mrb[2].mxu1 }
 0x1e6   : > { %529 = vst [vmem:[%s284_s23] sm:$0xff] %v528_v33  ;;  %v721_v36 = vpop.f32.mrb[3].mxu1 }
 0x1e7 PF: > { %s15_s20 = sadd.s32 1, %s788_s20   ;;  %s926_s18 = smov %s784_s19 }
 0x1e8   : > { %p12_p5 = scmp.ge.s32.totalorder %s15_s20, 4   ;;  %s927_s19 = smov %s929_s21 }
 0x1ea   :  { %14 = sbr.rel (!%p12_p5) target bundleno = 2 (0x2), region = 87 }

</bundles_post_ra>
